<compile_context>
chip_gen: v5e
topology: v5e:2x2
jax: 0.10.0
libtpu: 0.0.40
codegen_flags: <defaults>
</compile_context>

<pallas_src>
import jax
import jax.numpy as jnp
from jax.experimental import pallas as pl
from jax.experimental.pallas import tpu as pltpu

EPS = 1e-4


def _round_up(a: int, b: int) -> int:
    return ((a + b - 1) // b) * b


def _vmem_capacity_bytes() -> int:
    """Physical VMEM of the current chip (64 MiB v7x, 128 MiB v5e/v6e)."""
    try:
        return int(pltpu.get_tpu_info().vmem_capacity_bytes)
    except Exception:
        return 64 * 1024 * 1024  # conservative fallback (v7x per-TC VMEM)


# ---------------------------------------------------------------------------
# Kernel: one (tile_m, tile_n) output tile; K is the last ("arbitrary") axis.
# ---------------------------------------------------------------------------
def _mplinear_kernel(x_ref, w_ref, inv_ref, o_ref, acc_ref):
    k = pl.program_id(2)

    @pl.when(k == 0)
    def _():
        acc_ref[...] = jnp.zeros_like(acc_ref)

    # Canonical MXU contraction: x (tm, tk) @ w_t (tk, tn), fp32 accumulation.
    acc_ref[...] += jnp.dot(
        x_ref[...], w_ref[...], preferred_element_type=jnp.float32
    )

    @pl.when(k == pl.num_programs(2) - 1)
    def _():
        # Per-output-column scale by the inverse weight-row norm (fp32), then cast.
        o_ref[...] = (acc_ref[...] * inv_ref[...]).astype(o_ref.dtype)


def mp_linear(x, weight, *, tile_m=512, tile_n=512, tile_k=512):
    """x: (..., in_features), weight: (out_features, in_features)."""
    K = x.shape[-1]
    N = weight.shape[0]
    lead = x.shape[:-1]
    x2d = x.reshape(-1, K)
    M = x2d.shape[0]
    out_dtype = x.dtype

    x_item = jnp.dtype(x2d.dtype).itemsize
    w_item = jnp.dtype(weight.dtype).itemsize
    o_item = jnp.dtype(out_dtype).itemsize
    sub_m = {4: 8, 2: 16, 1: 32}.get(x_item, 8)  # sublane multiple for x dtype

    # ---- one-shot fp32 inverse row norms (O(N*K)) + (K, N) weight layout ----
    w32 = weight.astype(jnp.float32)
    inv_row = (1.0 / (EPS + jnp.sqrt(jnp.sum(w32 * w32, axis=1)))).reshape(1, N)
    w_t = weight.T  # (K, N): canonical MXU layout, reused across all M tiles.

    # ---- chip-aware VMEM budget and tile selection ---------------------------
    vmem_budget = min(int(_vmem_capacity_bytes() * 0.6), 96 * 1024 * 1024)

    def footprint(tm, tn, tk):
        return (2 * tm * tk * x_item      # x tile, double-buffered
                + 2 * tk * tn * w_item    # weight tile, double-buffered
                + 2 * tn * 4              # inv row
                + 2 * tm * tn * o_item    # output tile, double-buffered
                + tm * tn * 4)            # fp32 accumulator scratch

    # Strategy 1: weight-resident — whole (K, N) weight lives in VMEM, the grid
    # streams only M tiles (weight is DMA'd exactly once).
    tm = tn = tk = None
    resident = False
    tm_candidates = [tile_m] + [t for t in (256, 128) if t < tile_m]
    for tm_try in tm_candidates:
        tm_r = M if M <= tm_try else tm_try
        if footprint(tm_r, N, K) <= vmem_budget:
            tm, tn, tk, resident = tm_r, N, K, True
            break

    if not resident:
        # Strategy 2: standard (M, N, K) tiling with partial edge blocks.
        tm = M if M <= tile_m else tile_m
        tn = N if N <= tile_n else tile_n
        tk = K if K <= tile_k else tile_k
        while footprint(tm, tn, tk) > vmem_budget:
            if tk < K and tk > 128:
                tk //= 2
            elif tn < N and tn > 128:
                tn //= 2
            elif tm < M and tm > sub_m:
                tm //= 2
            else:
                break

    # ---- K must be covered exactly (stale lanes in a partial K block would ---
    # ---- corrupt valid outputs).  Ragged M / N is handled by partial edge ----
    # ---- blocks whose garbage rows/cols are never stored. --------------------
    Kp = K
    if tk < K and K % tk != 0:
        if footprint(tm, tn, K) <= vmem_budget:
            tk = K                       # full-K block: no padding needed
        else:
            cand = (tk // 128) * 128     # largest 128-aligned divisor of K, if any
            new_tk = 0
            while cand >= 128:
                if K % cand == 0:
                    new_tk = cand
                    break
                cand -= 128
            if new_tk:
                tk = new_tk
            else:
                Kp = _round_up(K, tk)    # zero-pad along K only (dot-safe)
                x2d = jnp.pad(x2d, ((0, 0), (0, Kp - K)))
                w_t = jnp.pad(w_t, ((0, Kp - K), (0, 0)))

    gm = pl.cdiv(M, tm)
    gn = pl.cdiv(N, tn)
    gk = Kp // tk

    # Advisory cost: account for re-streaming (x read gn times, w read gm times
    # unless VMEM-resident).
    w_reads = 1 if (gn == 1 and gk == 1) else gm
    cost = pl.CostEstimate(
        flops=2 * M * N * Kp,
        transcendentals=0,
        bytes_accessed=(gn * M * Kp * x_item
                        + w_reads * Kp * N * w_item
                        + gm * N * 4
                        + M * N * o_item),
    )

    out = pl.pallas_call(
        _mplinear_kernel,
        out_shape=jax.ShapeDtypeStruct((M, N), out_dtype),
        grid_spec=pltpu.PrefetchScalarGridSpec(
            num_scalar_prefetch=0,
            grid=(gm, gn, gk),
            in_specs=[
                pl.BlockSpec((tm, tk), lambda i, j, k: (i, k)),
                pl.BlockSpec((tk, tn), lambda i, j, k: (k, j)),
                pl.BlockSpec((1, tn), lambda i, j, k: (0, j)),
            ],
            out_specs=pl.BlockSpec((tm, tn), lambda i, j, k: (i, j)),
            scratch_shapes=[pltpu.VMEM((tm, tn), jnp.float32)],
        ),
        compiler_params=pltpu.CompilerParams(
            dimension_semantics=("parallel", "parallel", "arbitrary"),
            vmem_limit_bytes=vmem_budget,
        ),
        cost_estimate=cost,
    )(x2d, w_t, inv_row)

    return out.reshape(*lead, N)


def mp_linear_ref(x, weight):
    """Pure-JAX reference mirroring the PyTorch module."""
    w32 = weight.astype(jnp.float32)
    n = EPS + jnp.linalg.norm(w32, axis=-1, keepdims=True)
    w_norm = weight / n.astype(weight.dtype)
    return jnp.einsum("...k,nk->...n", x, w_norm)


if __name__ == "__main__":
    key = jax.random.PRNGKey(0)
    k_w, k_x = jax.random.split(key)

    batch, seq, in_features, out_features = 2, 8, 32, 64

    # Deterministic parameter init mirroring __init__: unit_norm(randn(out, in)).
    w_raw = jax.random.normal(k_w, (out_features, in_features), dtype=jnp.float32)
    w_n = EPS + jnp.linalg.norm(w_raw, axis=-1, keepdims=True)
    weight = w_raw / w_n

    x = jax.random.normal(k_x, (batch, seq, in_features), dtype=jnp.float32)

    y = jax.block_until_ready(mp_linear(x, weight))
    y_ref = mp_linear_ref(x, weight)

    assert y.shape == (batch, seq, out_features)
    assert jnp.allclose(y, y_ref, atol=1e-4, rtol=1e-4), "mismatch vs reference"
    print("KERNEL_OK")
</pallas_src>

<mosaic_0001>
module attributes {stable_mosaic.version = 11 : i64} {
  func.func @_mplinear_kernel(%arg0: i32, %arg1: i32, %arg2: i32, %arg3: memref<16x32xf32, #tpu.memory_space<vmem>>, %arg4: memref<32x64xf32, #tpu.memory_space<vmem>>, %arg5: memref<1x64xf32, #tpu.memory_space<vmem>>, %arg6: memref<16x64xf32, #tpu.memory_space<vmem>>, %arg7: memref<16x64xf32, #tpu.memory_space<vmem>>) attributes {dimension_semantics = [#tpu.dimension_semantics<parallel>, #tpu.dimension_semantics<parallel>, #tpu.dimension_semantics<arbitrary>], iteration_bounds = array<i64: 1, 1, 1>, scalar_prefetch = 0 : i64, scratch_operands = 1 : i64, tpu.core_type = #tpu.core_type<tc>, window_params = [{transform_indices = @transform_0, window_bounds = array<i64: 16, 32>}, {transform_indices = @transform_1, window_bounds = array<i64: 32, 64>}, {transform_indices = @transform_2, window_bounds = array<i64: 1, 64>}, {transform_indices = @transform_3, window_bounds = array<i64: 16, 64>}]} {
    %c0_i32 = arith.constant 0 : i32
    %0 = arith.cmpi eq, %arg2, %c0_i32 : i32
    %1 = arith.extui %0 : i1 to i32
    %c0_i32_0 = arith.constant 0 : i32
    %2 = arith.cmpi ne, %1, %c0_i32_0 : i32
    scf.if %2 {
      %cst_10 = arith.constant 0.000000e+00 : f32
      %12 = vector.broadcast %cst_10 : f32 to vector<16x64xf32>
      %c0_11 = arith.constant 0 : index
      %c0_12 = arith.constant 0 : index
      %13 = vector.load %arg7[%c0_11, %c0_12] : memref<16x64xf32, #tpu.memory_space<vmem>>, vector<16x64xf32>
      tpu.vector_store %arg7[%c0_11, %c0_12], %12 {strides = array<i32>} : memref<16x64xf32, #tpu.memory_space<vmem>>, vector<16x64xf32>,
    } else {
    }
    %c0 = arith.constant 0 : index
    %c0_1 = arith.constant 0 : index
    %3 = vector.load %arg7[%c0, %c0_1] : memref<16x64xf32, #tpu.memory_space<vmem>>, vector<16x64xf32>
    %c0_2 = arith.constant 0 : index
    %c0_3 = arith.constant 0 : index
    %4 = vector.load %arg3[%c0_2, %c0_3] : memref<16x32xf32, #tpu.memory_space<vmem>>, vector<16x32xf32>
    %c0_4 = arith.constant 0 : index
    %c0_5 = arith.constant 0 : index
    %5 = vector.load %arg4[%c0_4, %c0_5] : memref<32x64xf32, #tpu.memory_space<vmem>>, vector<32x64xf32>
    %cst = arith.constant dense<0.000000e+00> : vector<16x64xf32>
    %6 = tpu.matmul %4, %5, %cst {dimension_numbers = #tpu.dot_dimension_numbers<[1], [0], [0], [1], [0, 0, 1, 1], [], []>} : vector<16x32xf32>, vector<32x64xf32>, vector<16x64xf32> -> vector<16x64xf32>
    %7 = arith.addf %3, %6 : vector<16x64xf32>
    %c0_6 = arith.constant 0 : index
    %c0_7 = arith.constant 0 : index
    %8 = vector.load %arg7[%c0_6, %c0_7] : memref<16x64xf32, #tpu.memory_space<vmem>>, vector<16x64xf32>
    tpu.vector_store %arg7[%c0_6, %c0_7], %7 {strides = array<i32>} : memref<16x64xf32, #tpu.memory_space<vmem>>, vector<16x64xf32>,
    %c0_i32_8 = arith.constant 0 : i32
    %9 = arith.cmpi eq, %arg2, %c0_i32_8 : i32
    %10 = arith.extui %9 : i1 to i32
    %c0_i32_9 = arith.constant 0 : i32
    %11 = arith.cmpi ne, %10, %c0_i32_9 : i32
    scf.if %11 {
      %c0_10 = arith.constant 0 : index
      %c0_11 = arith.constant 0 : index
      %12 = vector.load %arg7[%c0_10, %c0_11] : memref<16x64xf32, #tpu.memory_space<vmem>>, vector<16x64xf32>
      %c0_12 = arith.constant 0 : index
      %c0_13 = arith.constant 0 : index
      %13 = vector.load %arg5[%c0_12, %c0_13] : memref<1x64xf32, #tpu.memory_space<vmem>>, vector<1x64xf32>
      %14 = vector.broadcast %13 : vector<1x64xf32> to vector<16x64xf32>
      %15 = arith.mulf %12, %14 : vector<16x64xf32>
      %c0_14 = arith.constant 0 : index
      %c0_15 = arith.constant 0 : index
      %16 = vector.load %arg6[%c0_14, %c0_15] : memref<16x64xf32, #tpu.memory_space<vmem>>, vector<16x64xf32>
      tpu.vector_store %arg6[%c0_14, %c0_15], %15 {strides = array<i32>} : memref<16x64xf32, #tpu.memory_space<vmem>>, vector<16x64xf32>,
    } else {
    }
    return
  }
  func.func @transform_0(%arg0: i32, %arg1: i32, %arg2: i32) -> (i32, i32) {
    %c0_i32 = arith.constant 0 : i32
    return %arg0, %arg2 : i32, i32
  }
  func.func @transform_1(%arg0: i32, %arg1: i32, %arg2: i32) -> (i32, i32) {
    %c0_i32 = arith.constant 0 : i32
    return %arg2, %arg1 : i32, i32
  }
  func.func @transform_2(%arg0: i32, %arg1: i32, %arg2: i32) -> (i32, i32) {
    %c0_i32 = arith.constant 0 : i32
    %c0_i32_0 = arith.constant 0 : i32
    return %c0_i32, %arg1 : i32, i32
  }
  func.func @transform_3(%arg0: i32, %arg1: i32, %arg2: i32) -> (i32, i32) {
    %c0_i32 = arith.constant 0 : i32
    return %arg0, %arg1 : i32, i32
  }
}

</mosaic_0001>

<bundles_post_ra>
// kernel: tpu_custom_call.1
= control target key start
LH: loop header
LB: loop body
LE: loop exit
PB: predicated region body
PF: predicated region fallthrough
CT: control target
= control target key end

     0   :  { %8 = vsyncpa [#allocation4], 0  ;;  %s274_s0 = inlined_call_operand.hbm [shape: f32[16,32], index: 0, kind: input, shape index: {}]   ;;  %s275_s1 = inlined_call_operand.hbm [shape: f32[32,64], index: 1, kind: input, shape index: {}]   ;;  %s276_s2 = inlined_call_operand.vmem [shape: f32[1,64], index: 2, kind: input, shape index: {}]   ;;  %s277_s3 = inlined_call_operand.hbm [shape: f32[16,64], index: 3, kind: output, shape index: {}]  }
   0x1   :  { %9 = vsyncpa [#allocation7], 0 }
   0x2   :  { %10 = vsyncpa [#allocation5], 0  ;;  %s15_s14 = sshll.u32 %s274_s0, 4  ;;  %s221_s15 = smov [#allocation3]   ;;  %s16_s14 = int_to_ptr.hbm [resolvable:$true] %s15_s14 }
   0x3   :  { %s17_s16 = sshll.u32 %s221_s15, 4  ;;  %s28_s19 = sshll.u32 %s275_s1, 4  ;;  %s18_s16 = int_to_ptr.vmem [resolvable:$true] %s17_s16  ;;  %s29_s19 = int_to_ptr.hbm [resolvable:$true] %s28_s19 }
   0x4   :  { %s222_s20 = smov 128   ;;  %s223_s21 = smov 8  }
   0x5   :  { %23 = dma.hbm_to_vmem [thread:$0]  %s16_s14, 256, %s18_s16, [#allocation4], %s222_s20, %s222_s20, %s223_s21  }
   0x6   :  { %s224_s22 = smov [#allocation6]  }
   0x7   :  { %s30_s23 = sshll.u32 %s224_s22, 4  ;;  %s31_s23 = int_to_ptr.vmem [resolvable:$true] %s30_s23 }
   0x8   :  { %36 = dma.hbm_to_vmem [thread:$0]  %s29_s19, 512, %s31_s23, [#allocation7], %s222_s20, %s222_s20, %s223_s21  }
   0x9   :  { %215 = dma.done.wait [#allocation4], 256  }
   0xa   :  { %216 = vsyncadd [#allocation4], 4294967040 }
   0xb   :  { %217 = dma.done.wait [#allocation7], 512  }
   0xc   :  { %218 = vsyncadd [#allocation7], 4294966784  ;;  %vm51_vm0 = vcmask 523264   ;;  %v225_v0 = vmov 0.0   ;;  %v61_v1 = vld [vmem:[#allocation6 + $0x18] sm:$0xff]  ;;  %v60_v2 = vld [vmem:[#allocation6 + $0x10] sm:$0xff] }
   0xd   :  { %52 = vst.msk [vmem:[#allocation2] sm:$0xff] %vm51_vm0, %v225_v0  ;;  %81 = vmatpush.msra.mxu0 %v61_v1  ;;  %132 = vmatpush.msra.mxu1 %v61_v1  ;;  %v59_v3 = vld [vmem:[#allocation6 + $0x8] sm:$0xff]  ;;  %v58_v4 = vld [vmem:[#allocation6] sm:$0xff]  ;;  %v56_v5 = vld [vmem:[#allocation3] sm:$0xff]  ;;  %vm62_vm1 = vcmask 261120   ;;  %s226_s24 = smov [#allocation8]  }
   0xe   :  { %53 = vst.msk [vmem:[#allocation2 + $0x8] sm:$0xff] %vm51_vm0, %v225_v0  ;;  %v57_v6 = vld [vmem:[#allocation3 + $0x8] sm:$0xff]  ;;  %v142_v13 = vld [vmem:[%s276_s2] ss:$0 sm:$0xff]  ;;  %s114_s25 = sshll.u32 %s226_s24, 4  ;;  %s116_s28 = sshll.u32 %s277_s3, 4  ;;  %s115_s25 = int_to_ptr.vmem [resolvable:$true] %s114_s25  ;;  %s117_s28 = int_to_ptr.hbm [resolvable:$true] %s116_s28 }
   0xf   :  { %82 = vmatpush.msra.mxu0 %v60_v2  ;;  %133 = vmatpush.msra.mxu1 %v60_v2 }
  0x11   :  { %83 = vmatpush.msra.mxu0 %v59_v3  ;;  %134 = vmatpush.msra.mxu1 %v59_v3 }
  0x13   :  { %84 = vmatpush.msra.mxu0 %v58_v4  ;;  %135 = vmatpush.msra.mxu1 %v58_v4 }
  0x14   :  { %130 = vmatmul.msk.f32.vlgmr.msra.gmra.mxu0 %vm62_vm1, %v56_v5  ;;  %131 = vmatmul.msk.f32.vlgmr.msra.gmra.mxu1 %vm62_vm1, %v57_v6  ;;  %v54_v7 = vld [vmem:[#allocation2] sm:$0xff] }
  0x15   :  { %v55_v8 = vld [vmem:[#allocation2 + $0x8] sm:$0xff] }
  0x91   :  { %v86_v9 = vpop.f32.mrf.mxu0  ;;  %v89_v10 = vpop.f32.mrf.mxu1 }
  0x92   :  { %v92_v11 = vadd.f32 %v86_v9, %v54_v7  ;;  %v93_v12 = vadd.f32 %v89_v10, %v55_v8 }
  0x94   :  { %95 = vst.msk [vmem:[#allocation2] sm:$0xff] %vm51_vm0, %v92_v11 }
  0x95   :  { %96 = vst.msk [vmem:[#allocation2 + $0x8] sm:$0xff] %vm51_vm0, %v93_v12 }
  0x9b   :  { %v100_v14 = vld [vmem:[#allocation2] sm:$0xff] }
  0x9c   :  { %v101_v15 = vld [vmem:[#allocation2 + $0x8] sm:$0xff]  ;;  %v106_v16 = vmul.f32 %v142_v13, %v100_v14 }
  0x9d   :  { %v107_v17 = vmul.f32 %v142_v13, %v101_v15 }
  0x9e   :  { %108 = vst.msk [vmem:[#allocation8] sm:$0xff] %vm51_vm0, %v106_v16 }
  0x9f   :  { %109 = vst.msk [vmem:[#allocation8 + $0x8] sm:$0xff] %vm51_vm0, %v107_v17 }
  0xa0   :  { %122 = dma.vmem_to_hbm [thread:$0]  %s115_s25, 256, %s117_s28, [#allocation5], %s222_s20, %s222_s20, %s223_s21  }
  0xa1   :  { %219 = dma.done.wait [#allocation5], 256  }
  0xa2   :  { %220 = vsyncadd [#allocation5], 4294967040 }
  0xa3   :  { %127 = vsyncpa [#allocation4], 1 }
  0xa4   :  { %128 = vsyncpa [#allocation7], 1 }
  0xa5   :  { %129 = vsyncpa [#allocation5], 1 }

</bundles_post_ra>
